<compile_context>
chip_gen: v5e
topology: v5e:2x2
jax: 0.10.0
libtpu: 0.0.40
codegen_flags: <defaults>
</compile_context>

<pallas_src>
import math

import jax
import jax.numpy as jnp
from jax.experimental import pallas as pl
from jax.experimental.pallas import tpu as pltpu

_LANE = 128
# Per-tile VMEM target: 3 arrays (x, pe, out) x 2 pipeline buffers x 2 MiB
# = 12 MiB total scratch -> fits every generation's default scoped-VMEM limit.
_TARGET_TILE_BYTES = 2 * 1024 * 1024


def _build_pe_table(embed_size: int, max_len: int = 512) -> jnp.ndarray:
    """Deterministic sinusoidal table, identical to the PyTorch __init__."""
    position = jnp.arange(0, max_len, dtype=jnp.float32)[:, None]          # (L, 1)
    div_term = jnp.exp(
        jnp.arange(0, embed_size, 2, dtype=jnp.float32)
        * (-math.log(10000.0) / embed_size)
    )                                                                       # (ceil(E/2),)
    pe = jnp.zeros((max_len, embed_size), dtype=jnp.float32)
    pe = pe.at[:, 0::2].set(jnp.sin(position * div_term))
    pe = pe.at[:, 1::2].set(jnp.cos(position * div_term[: embed_size // 2]))
    return pe[None, :, :]                                                   # (1, L, E)


def _sublane(dtype) -> int:
    """Minimum second-to-last block multiple for this dtype's packing."""
    return max(8, 32 // jnp.dtype(dtype).itemsize)


def _round_down(v: int, m: int) -> int:
    return max(m, (v // m) * m)


def _pick_tile(total_rows: int, row_bytes: int, dtype, batch: int) -> int:
    """Tile length along the row axis: a multiple of the sublane count (or the
    full extent), within the per-tile VMEM budget, with >= 2 grid steps so both
    v7x TensorCores get work."""
    sub = _sublane(dtype)
    max_rows = max(sub, _TARGET_TILE_BYTES // max(1, row_bytes))
    tile = total_rows if total_rows <= max_rows else _round_down(max_rows, sub)
    # v7x dual-TensorCore: guarantee at least 2 parallel grid steps.
    if batch * pl.cdiv(total_rows, tile) < 2 and total_rows >= 2 * sub:
        tile = _round_down(pl.cdiv(total_rows, 2), sub)
    return tile


def _pe_add_kernel(x_ref, pe_ref, o_ref):
    # x_ref / pe_ref / o_ref: (1, tile, C) lane-dense tiles.
    o_ref[...] = x_ref[...] + pe_ref[...]


def _pallas_add(x3: jnp.ndarray, pe3: jnp.ndarray, tile: int) -> jnp.ndarray:
    """x3: (B, R, C); pe3: (1, Rp, C) with Rp >= R.  Returns x3 + pe3[:, :R]."""
    B, R, C = x3.shape
    n_tiles = pl.cdiv(R, tile)
    return pl.pallas_call(
        _pe_add_kernel,
        out_shape=jax.ShapeDtypeStruct((B, R, C), x3.dtype),
        grid_spec=pltpu.PrefetchScalarGridSpec(
            num_scalar_prefetch=0,
            # B is the inner axis: pe's block index is constant across it, so
            # its DMA is elided after the first batch element of each row tile.
            grid=(n_tiles, B),
            in_specs=[
                pl.BlockSpec((1, tile, C), lambda r, b: (b, r, 0)),   # x
                pl.BlockSpec((1, tile, C), lambda r, b: (0, r, 0)),   # pe prefix
            ],
            out_specs=pl.BlockSpec((1, tile, C), lambda r, b: (b, r, 0)),
        ),
        compiler_params=pltpu.CompilerParams(
            dimension_semantics=("parallel", "parallel"),
        ),
    )(x3, pe3)


def positional_encoding_forward(x: jnp.ndarray, pe_full: jnp.ndarray) -> jnp.ndarray:
    """x: (B, S, E); pe_full: (1, max_len, E). Returns x + pe_full[:, :S, :]."""
    B, S, E = x.shape
    max_len = pe_full.shape[1]
    if S > max_len:
        raise ValueError(f"seq_len {S} exceeds positional table max_len {max_len}")
    if pe_full.dtype != x.dtype:
        # One-time cast (table should be stored pre-cast to the model dtype).
        pe_full = pe_full.astype(x.dtype)

    itemsize = jnp.dtype(x.dtype).itemsize
    sub = _sublane(x.dtype)

    if E % _LANE == 0:
        # Natural shape is already lane-dense: no reshape (avoids hidden
        # relayout copies), pe prefix read straight from the full table.
        tile_s = _pick_tile(S, E * itemsize, x.dtype, B)
        pe_arr = pe_full
        if tile_s % sub != 0:
            # tile equals a non-sublane-multiple full seq extent; the pe
            # BlockSpec then needs its row dim to equal its array dim too.
            pe_arr = pe_full[:, :S, :]
        return _pallas_add(x, pe_arr, tile_s)

    flat = S * E
    if flat % _LANE == 0:
        # E < 128 but (S, E) folds exactly into 128-lane rows.
        rows = flat // _LANE
        x2 = x.reshape(B, rows, _LANE)
        pe2 = pe_full[:, :S, :].reshape(1, rows, _LANE)
        tile_r = _pick_tile(rows, _LANE * itemsize, x.dtype, B)
        out2 = _pallas_add(x2, pe2, tile_r)
        return out2.reshape(B, S, E)

    # Lane-sparse / awkward shapes: a Pallas launch would be pure overhead
    # (masked partial stores, <128 lanes). Let XLA fuse the broadcast add.
    return x + pe_full[:, :S, :]


if __name__ == "__main__":
    # Small shapes consistent with the module: batch=2, seq=8, embed=32.
    B, S, E = 2, 8, 32
    MAX_LEN = 512

    key = jax.random.PRNGKey(0)
    x = jax.random.normal(key, (B, S, E), dtype=jnp.float32)
    pe_full = _build_pe_table(E, MAX_LEN)

    ref = x + pe_full[:, :S, :]                 # pure-JAX reference
    out = jax.block_until_ready(positional_encoding_forward(x, pe_full))
    assert out.shape == (B, S, E)
    assert jnp.allclose(out, ref, atol=1e-6), "mismatch vs reference (reshape path)"

    # Extra coverage: natural lane-dense path (E % 128 == 0, no reshape).
    B2, S2, E2 = 2, 16, 128
    x_b = jax.random.normal(jax.random.PRNGKey(1), (B2, S2, E2), dtype=jnp.float32)
    pe_b = _build_pe_table(E2, MAX_LEN)
    ref_b = x_b + pe_b[:, :S2, :]
    out_b = jax.block_until_ready(positional_encoding_forward(x_b, pe_b))
    assert jnp.allclose(out_b, ref_b, atol=1e-6), "mismatch vs reference (natural path)"

    print("KERNEL_OK")
</pallas_src>

<mosaic_0001>
module attributes {stable_mosaic.version = 11 : i64} {
  func.func @_pe_add_kernel(%arg0: i32, %arg1: i32, %arg2: memref<1x2x128xf32, #tpu.memory_space<vmem>>, %arg3: memref<1x2x128xf32, #tpu.memory_space<vmem>>, %arg4: memref<1x2x128xf32, #tpu.memory_space<vmem>>) attributes {dimension_semantics = [#tpu.dimension_semantics<parallel>, #tpu.dimension_semantics<parallel>], iteration_bounds = array<i64: 1, 2>, scalar_prefetch = 0 : i64, scratch_operands = 0 : i64, tpu.core_type = #tpu.core_type<tc>, window_params = [{transform_indices = @transform_0, window_bounds = array<i64: 1, 2, 128>}, {transform_indices = @transform_1, window_bounds = array<i64: 1, 2, 128>}, {transform_indices = @transform_2, window_bounds = array<i64: 1, 2, 128>}]} {
    %c0 = arith.constant 0 : index
    %c0_0 = arith.constant 0 : index
    %c0_1 = arith.constant 0 : index
    %0 = vector.load %arg2[%c0, %c0_0, %c0_1] : memref<1x2x128xf32, #tpu.memory_space<vmem>>, vector<1x2x128xf32>
    %c0_2 = arith.constant 0 : index
    %c0_3 = arith.constant 0 : index
    %c0_4 = arith.constant 0 : index
    %1 = vector.load %arg3[%c0_2, %c0_3, %c0_4] : memref<1x2x128xf32, #tpu.memory_space<vmem>>, vector<1x2x128xf32>
    %2 = arith.addf %0, %1 : vector<1x2x128xf32>
    %c0_5 = arith.constant 0 : index
    %c0_6 = arith.constant 0 : index
    %c0_7 = arith.constant 0 : index
    %3 = vector.load %arg4[%c0_5, %c0_6, %c0_7] : memref<1x2x128xf32, #tpu.memory_space<vmem>>, vector<1x2x128xf32>
    tpu.vector_store %arg4[%c0_5, %c0_6, %c0_7], %2 {strides = array<i32>} : memref<1x2x128xf32, #tpu.memory_space<vmem>>, vector<1x2x128xf32>,
    return
  }
  func.func @transform_0(%arg0: i32, %arg1: i32) -> (i32, i32, i32) {
    %c0_i32 = arith.constant 0 : i32
    %c0_i32_0 = arith.constant 0 : i32
    return %arg1, %arg0, %c0_i32 : i32, i32, i32
  }
  func.func @transform_1(%arg0: i32, %arg1: i32) -> (i32, i32, i32) {
    %c0_i32 = arith.constant 0 : i32
    %c0_i32_0 = arith.constant 0 : i32
    %c0_i32_1 = arith.constant 0 : i32
    return %c0_i32, %arg0, %c0_i32_0 : i32, i32, i32
  }
  func.func @transform_2(%arg0: i32, %arg1: i32) -> (i32, i32, i32) {
    %c0_i32 = arith.constant 0 : i32
    %c0_i32_0 = arith.constant 0 : i32
    return %arg1, %arg0, %c0_i32 : i32, i32, i32
  }
}

</mosaic_0001>

<bundles_post_ra>
// kernel: tpu_custom_call.1
= control target key start
LH: loop header
LB: loop body
LE: loop exit
PB: predicated region body
PF: predicated region fallthrough
CT: control target
= control target key end

     0   :  { %7 = vsyncpa [#allocation3], 0  ;;  %s714_s0 = inlined_call_operand.hbm [shape: f32[2,2,128], index: 0, kind: input, shape index: {}]   ;;  %s715_s1 = inlined_call_operand.hbm [shape: f32[1,2,128], index: 1, kind: input, shape index: {}]   ;;  %s716_s2 = inlined_call_operand.hbm [shape: f32[2,2,128], index: 2, kind: output, shape index: {}]  }
   0x1   :  { %9 = vsyncpa [#allocation3 + $0x1], 0 }
   0x2   :  { %10 = vsyncpa [#allocation6], 0 }
   0x3   :  { %11 = vsyncpa [#allocation4], 0 }
   0x4   :  { %13 = vsyncpa [#allocation4 + $0x1], 0  ;;  %s565_s9 = smov 0   ;;  %s567_s10 = smov 0  }
   0x5   :  { %s569_s11 = smov 0   ;;  %s571_s12 = smov 0  }
   0x6   :  { %s573_s13 = smov 0   ;;  %s575_s14 = smov 0  }
   0x7 LB: > { %s313_s15 = sadd.s32 4294967295, %s547_s14   ;;  %s314_s16 = sadd.s32 4294967294, %s547_s14   ;;  %s547_s14 = sphi %s575_s14, %s19_s14   ;;  %s543_s13 = sphi %s573_s13, %s728_s13   ;;  %s539_s12 = sphi %s571_s12, %s727_s12   ;;  %s535_s11 = sphi %s569_s11, %s726_s11   ;;  %s531_s10 = sphi %s567_s10, %s725_s10   ;;  %s527_s9 = sphi %s565_s9, %s724_s9  }
   0x8   : > { %p53_p0 = scmp.ne.s32.totalorder %s531_s10, %s527_s9  ;;  %p599_p1 = scmp.eq.s32.totalorder %s313_s15, 0 }
   0x9   : > { %p603_p2 = scmp.eq.s32.totalorder %s313_s15, 1  ;;  %p111_p3 = scmp.eq.s32.totalorder %s314_s16, 1 }
   0xa   : > { %p609_p4 = por %p599_p1, %p53_p0  ;;  %p315_p5 = scmp.ge.s32.totalorder %s547_s14, 1 }
   0xb   : > { %p614_p6 = por %p111_p3, %p53_p0  ;;  %p118_p7 = scmp.lt.s32.totalorder %s547_s14, 3 }
   0xc   : > { %s132_s23 = sshll.u32 %s715_s1, 4  ;;  %p317_p9 = scmp.ge.s32.totalorder %s547_s14, 2  ;;  %s133_s23 = int_to_ptr.hbm [resolvable:$true] %s132_s23 }
   0xd   : > { %p622_p8 = pnand %p315_p5, %p118_p7  ;;  %s549_s25 = smov [#allocation5]  }
   0xe   : > { %s134_s26 = sshll.u32 %s549_s25, 4  ;;  %s28_s27 = sadd.s32 1, %s543_s13  ;;  %s135_s26 = int_to_ptr.vmem [resolvable:$true] %s134_s26 }
   0xf   : > { %p336_p10 = pneg %p622_p8  ;;  %p29_p12 = scmp.ge.s32.totalorder %s28_s27, 2 }
  0x10   : > { %s40_s28 = sadd.s32 1, %s535_s11  ;;  %p47_p13 = scmp.ne.s32.totalorder %s535_s11, %s531_s10 }
  0x11   : > { %p337_p11 = pnand %p336_p10, %p599_p1  ;;  %p48_p0 = scmp.eq.s32.totalorder %s547_s14, 0 }
  0x12   : > { %s730_s27 = smov (%p29_p12, %s28_s27), 0  ;;  %p644_p5 = por %p603_p2, %p47_p13 }
  0x13   : > { %339 = dma.hbm_to_vmem [thread:$0]  (!%p337_p11), %s133_s23, 32, %s135_s26, [#allocation6]  }
  0x14   : > { %p638_p3 = por %p48_p0, %p47_p13  ;;  %s35_s3 = ssub.s32 %s543_s13, %s730_s27 }
  0x15   : > { %p349_p7 = scmp.lt.s32.totalorder %s547_s14, 2  ;;  %p38_p10 = scmp.eq.s32.totalorder %s35_s3, 0 }
  0x16   : > { %s145_s4 = sand.u32 1, %s535_s11   ;;  %s319_s7 = sshll.u32 %s543_s13, 1 }
  0x17   : > { %s318_s5 = sshll.u32 %s145_s4, 1  ;;  %s154_s16 = scalar_lea.hbm %s714_s0, %s319_s7 }
  0x18   : > { %s653_s6 = scalar_select %p38_p10, %s535_s11, %s40_s28  }
  0x19   : > { %s149_s21 = scalar_lea.vmem [#allocation2], %s318_s5  ;;  %s156_s18 = sshll.u32 %s154_s16, 4  ;;  %s157_s18 = int_to_ptr.hbm [resolvable:$true] %s156_s18 }
  0x1a   : > { %s158_s22 = sshll.u32 %s149_s21, 4  ;;  %p341_p2 = pnand %p349_p7, %p638_p3  ;;  %s159_s22 = int_to_ptr.vmem [resolvable:$true] %s158_s22 }
  0x1b   : > { %s146_s23 = scalar_lea.sflag [#allocation3], %s145_s4  ;;  %167 = sbr.rel (%p622_p8) target bundleno = 50 (0x32), region = 28 }
  0x1c   : > { %343 = dma.hbm_to_vmem [thread:$0]  (!%p341_p2), %s157_s18, 32, %s159_s22, %s146_s23  }
  0x1d   : > { %s664_s25 = sand.u32 (!%p622_p8), 1, %s531_s10  }
  0x1e   : > { %s321_s26 = sshll.u32 (!%p622_p8), %s664_s25, 1  ;;  %s170_s28 = scalar_lea.sflag (!%p622_p8), [#allocation3], %s664_s25 }
  0x1f   : > { %s173_s3 = scalar_lea.vmem (!%p622_p8), [#allocation2], %s321_s26 }
  0x20   : > { %514 = dma.done.wait (%p609_p4), %s170_s28, 32  }
  0x21   : > { %516 = vsyncadd (%p609_p4), %s170_s28, 4294967264 }
  0x22   : > { %518 = dma.done.wait (%p599_p1), [#allocation6], 32  }
  0x23   : > { %520 = vsyncadd (%p599_p1), [#allocation6], 4294967264  ;;  %s325_s24 = sshll.u32 %s539_s12, 1  ;;  %s199_s7 = scalar_lea.vmem [#allocation7], %s321_s26  ;;  %v200_v0 = vld [vmem:[%s173_s3] sm:$0x3] }
  0x24   : > { %s216_s5 = scalar_lea.hbm %s716_s2, %s325_s24  ;;  %s218_s8 = sshll.u32 %s199_s7, 4  ;;  %v201_v1 = vld [vmem:[#allocation5] sm:$0x3]  ;;  %s219_s8 = int_to_ptr.vmem [resolvable:$true] %s218_s8 }
  0x25   : > { %s220_s15 = sshll.u32 %s216_s5, 4  ;;  %v202_v2 = vadd.f32 %v201_v1, %v200_v0  ;;  %s205_s19 = scalar_lea.sflag [#allocation4], %s664_s25  ;;  %s221_s15 = int_to_ptr.hbm [resolvable:$true] %s220_s15 }
  0x26   : > { %s475_s17 = sshra.s32 %s221_s15, 4  ;;  %s481_s22 = scalar_lea.hbm %s716_s2, 4  ;;  %s476_s17 = int_to_ptr.hbm [resolvable:$true] %s475_s17 }
  0x27   : > { %203 = vst [vmem:[%s199_s7] sm:$0x3] %v202_v2  ;;  %s477_s16 = scalar_lea.hbm %s476_s17, 2  ;;  %p482_p11 = scmp.lt.s32.totalorder %s476_s17, %s716_s2 }
  0x28   : > { %p478_p1 = scmp.ne.s32.totalorder %s476_s17, %s477_s16  ;;  %p483_p12 = scmp.lt.s32.totalorder %s481_s22, %s477_s16 }
  0x2a   : > { %p479_p4 = pnand %p478_p1, %p644_p5  ;;  %p484_p13 = por %p483_p12, %p482_p11 }
  0x2c   : > { %p480_p8 = pneg %p479_p4 }
  0x2e   : > { %p485_p0 = pnand %p484_p13, %p480_p8 }
  0x30   : > { %488 = shalt.err (!%p485_p0)
}
  0x31   : > { %334 = dma.vmem_to_hbm [thread:$0]  (%p644_p5), %s219_s8, 32, %s221_s15, %s205_s19  }
  0x32 PF: > { %s232_s25 = sand.u32 1, %s527_s9   ;;  %p345_p3 = pnand %p317_p9, %p614_p6 }
  0x33   : > { %s233_s26 = scalar_lea.sflag [#allocation4], %s232_s25 }
  0x34   : > { %p346_p7 = pneg %p345_p3 }
  0x36   : > { %522 = dma.done.wait (%p346_p7), %s233_s26, 32  }
  0x37   : > { %524 = vsyncadd (%p346_p7), %s233_s26, 4294967264  ;;  %s19_s14 = sadd.s32 1, %s547_s14   ;;  %s724_s9 = smov %s531_s10 }
  0x38   : > { %p16_p10 = scmp.ge.s32.totalorder %s19_s14, 4   ;;  %s725_s10 = smov %s535_s11 }
  0x39   : > { %s726_s11 = smov %s653_s6  ;;  %s727_s12 = smov %s543_s13 }
  0x3a   : > { %s728_s13 = smov %s730_s27  ;;  %18 = sbr.rel (!%p16_p10) target bundleno = 7 (0x7), region = 78 }
  0x3f   :  { %239 = vsyncpa [#allocation3], 1 }
  0x40   :  { %241 = vsyncpa [#allocation3 + $0x1], 1 }
  0x41   :  { %242 = vsyncpa [#allocation6], 1 }
  0x42   :  { %243 = vsyncpa [#allocation4], 1 }
  0x43   :  { %245 = vsyncpa [#allocation4 + $0x1], 1 }

</bundles_post_ra>
